<compile_context>
chip_gen: v7x
topology: tpu7x:2x2x1
jax: 0.10.0
libtpu: 0.0.40
codegen_flags: <defaults>
</compile_context>

<pallas_src>
import functools

import jax
import jax.numpy as jnp
from jax import lax
from jax.experimental import pallas as pl
from jax.experimental.pallas import tpu as pltpu


def _largest_divisor_leq(n, cap):
    cap = int(max(1, min(n, cap)))
    for d in range(cap, 0, -1):
        if n % d == 0:
            return d
    return 1


def _focal_loss_kernel(logits_ref, labels_ref, sum_ref, cnt_ref, *,
                       gamma, ignore_lb, hw, tl, mask_tail):
    x = logits_ref[...].astype(jnp.float32)          # (bn, C, tl)
    lab = labels_ref[...].astype(jnp.int32)          # (bn, 1, tl)

    # Numerically-stable softmax statistics over the class (sublane) axis.
    m = jnp.max(x, axis=1, keepdims=True)            # (bn, 1, tl)
    z = x - m                                        # (bn, C, tl)
    s = jnp.sum(jnp.exp(z), axis=1, keepdims=True)   # (bn, 1, tl)

    # Gather the label class FIRST (one-hot compare + class-axis reduce over z
    # only), THEN apply the focal weighting on the gathered (bn, tl) row.
    # NOTE: labels outside [0, C) other than ignore_lb contribute 0 loss but are
    # counted as valid (PyTorch's NLLLoss would raise instead).
    cls = lax.broadcasted_iota(jnp.int32, x.shape, dimension=1)       # (bn, C, tl)
    onehot = cls == lab                                               # (bn, C, tl)
    z_lab = jnp.sum(jnp.where(onehot, z, 0.0), axis=1)                # (bn, tl)

    log_s = jnp.log(s[:, 0, :])                      # (bn, tl) lane-dense
    log_p_lab = z_lab - log_s                        # log_softmax at label class
    score_lab = jnp.exp(log_p_lab)                   # softmax at label class
    f = 1.0 - score_lab

    g = float(gamma)
    if g == 0.0:
        factor = jnp.ones_like(f)
    elif g == int(g) and 0 < int(g) <= 8:
        # Integer gamma (default 2): repeated multiply, no generic pow on the EUP.
        factor = f
        for _ in range(int(g) - 1):
            factor = factor * f
    else:
        factor = jnp.power(jnp.maximum(f, 0.0), jnp.float32(g))

    picked = factor * log_p_lab                      # (bn, tl)

    # NLLLoss(ignore_index): mask ignored labels; ragged-tail lanes only when
    # the spatial tiling is actually ragged (static check).
    valid = lab[:, 0, :] != ignore_lb                # (bn, tl)
    if mask_tail:
        j = pl.program_id(1)
        pos = j * tl + lax.broadcasted_iota(jnp.int32, valid.shape, dimension=1)
        valid = valid & (pos < hw)

    contrib = jnp.where(valid, -picked, 0.0)
    psum = jnp.sum(contrib)
    pcnt = jnp.sum(valid.astype(jnp.float32))

    # One full (1, 1, 8, 128) partial block per grid step (no masked tiny
    # stores, no cross-step accumulation); the wrapper reads element [0, 0].
    sum_ref[...] = jnp.full(sum_ref.shape, psum, jnp.float32)
    cnt_ref[...] = jnp.full(cnt_ref.shape, pcnt, jnp.float32)


def softmax_focal_loss(logits, labels, *, gamma=2.0, ignore_lb=255):
    """logits: (N, C, H, W) float32/bf16; labels: (N, H, W) int. Scalar loss."""
    N, C, H, W = logits.shape
    HW = H * W

    # Pure reshapes (no transpose / no pad): positions land on the lane axis.
    x = logits.reshape(N, C, HW)
    lab = labels.reshape(N, 1, HW)
    if (not jnp.issubdtype(lab.dtype, jnp.integer)) or lab.dtype.itemsize > 4:
        lab = lab.astype(jnp.int32)

    itemsize = x.dtype.itemsize
    lab_itemsize = lab.dtype.itemsize

    # Generation-aware VMEM budget: physical VMEM is 128 MiB on v5e/v6e but only
    # 64 MiB per TensorCore on v7x.  Keep the scoped limit at half of physical
    # and budget ~70% of it for double-buffered inputs + in-kernel f32 temps.
    vmem_cap = 64 * 1024 * 1024                      # conservative fallback (v7x)
    try:
        info = pltpu.get_tpu_info()
        vmem_cap = int(getattr(info, "vmem_capacity_bytes", vmem_cap)) or vmem_cap
    except Exception:
        pass
    vmem_limit = min(vmem_cap // 2, 64 * 1024 * 1024)

    # Per-logit-element VMEM cost (bytes), conservative:
    #   2*itemsize           double-buffered logits blocks
    #   ~20                  f32 (bn, C, tl) temporaries (z, exp, iota, select)
    #   ~(96 + 2*lab)/C      per-position temporaries (some sublane-padded) + labels
    per_elem = 2 * itemsize + 20
    per_pos = 96 + 2 * lab_itemsize
    budget = int(0.70 * vmem_limit)
    max_elems = max(C * 128, budget // (per_elem + (per_pos + C - 1) // C))
    target_elems = min(max_elems, 2 * 1024 * 1024)   # >= multi-MiB steps, capped

    per_image = C * HW
    if per_image <= target_elems:
        # Small images: batch bn images per step, full spatial extent per image
        # -> each step is one contiguous DMA of bn (C, HW) NCHW slabs.
        tl = HW
        bn = _largest_divisor_leq(N, max(1, target_elems // per_image))
    else:
        # Large images: tile the spatial axis in 128-lane multiples.
        bn = 1
        lanes = max(128, ((target_elems // C) // 128) * 128)
        tl = HW if lanes >= HW else lanes
    # TODO(synk): if xprof shows exposed DMA in the tl < HW (strided rows) case,
    # add pipeline_mode=pl.Buffered(3) on the logits BlockSpec.

    grid_n = N // bn
    grid_j = pl.cdiv(HW, tl)
    mask_tail = (HW % tl) != 0

    kernel = functools.partial(
        _focal_loss_kernel, gamma=float(gamma), ignore_lb=int(ignore_lb),
        hw=HW, tl=tl, mask_tail=mask_tail)

    part_shape = jax.ShapeDtypeStruct((grid_n, grid_j, 8, 128), jnp.float32)

    sums, cnts = pl.pallas_call(
        kernel,
        out_shape=(part_shape, part_shape),
        grid_spec=pltpu.PrefetchScalarGridSpec(
            num_scalar_prefetch=0,
            grid=(grid_n, grid_j),
            in_specs=[
                pl.BlockSpec((bn, C, tl), lambda n, j: (n, 0, j)),
                pl.BlockSpec((bn, 1, tl), lambda n, j: (n, 0, j)),
            ],
            out_specs=(
                pl.BlockSpec((1, 1, 8, 128), lambda n, j: (n, j, 0, 0)),
                pl.BlockSpec((1, 1, 8, 128), lambda n, j: (n, j, 0, 0)),
            ),
        ),
        compiler_params=pltpu.CompilerParams(
            dimension_semantics=("parallel", "parallel"),
            vmem_limit_bytes=int(vmem_limit),
        ),
    )(x, lab)

    # Mean over valid positions (NLLLoss reduction='mean'); tree-reduce the
    # per-step partials (element [0, 0] of each (8, 128) block) in XLA.
    total = jnp.sum(sums[:, :, 0, 0])
    count = jnp.sum(cnts[:, :, 0, 0])
    return total / count


def _reference_loss(logits, labels, gamma=2.0, ignore_lb=255):
    """Pure-JAX reference mirroring the PyTorch module."""
    scores = jax.nn.softmax(logits, axis=1)
    factor = jnp.power(1.0 - scores, gamma)
    log_score = factor * jax.nn.log_softmax(logits, axis=1)
    N, C, H, W = logits.shape
    ls = jnp.transpose(log_score, (0, 2, 3, 1)).reshape(-1, C)
    lab = labels.reshape(-1)
    valid = lab != ignore_lb
    safe_lab = jnp.where(valid, lab, 0)
    picked = jnp.take_along_axis(ls, safe_lab[:, None], axis=1)[:, 0]
    return jnp.sum(jnp.where(valid, -picked, 0.0)) / jnp.sum(valid.astype(jnp.float32))


if __name__ == "__main__":
    key = jax.random.PRNGKey(0)
    k_logits, k_labels, k_mask = jax.random.split(key, 3)

    N, C, H, W = 2, 4, 16, 16
    GAMMA = 2.0
    IGNORE = 255

    logits = jax.random.normal(k_logits, (N, C, H, W), dtype=jnp.float32)
    labels = jax.random.randint(k_labels, (N, H, W), 0, C, dtype=jnp.int32)
    # Sprinkle some ignored positions to exercise ignore_index handling.
    ignore_mask = jax.random.uniform(k_mask, (N, H, W)) < 0.1
    labels = jnp.where(ignore_mask, IGNORE, labels)

    loss = softmax_focal_loss(logits, labels, gamma=GAMMA, ignore_lb=IGNORE)
    loss = jax.block_until_ready(loss)

    ref = _reference_loss(logits, labels, gamma=GAMMA, ignore_lb=IGNORE)
    assert jnp.allclose(loss, ref, rtol=1e-5, atol=1e-5), (loss, ref)

    print("KERNEL_OK")
</pallas_src>

<mosaic_0001>
module attributes {stable_mosaic.version = 11 : i64} {
  func.func @_focal_loss_kernel(%arg0: i32, %arg1: i32, %arg2: memref<2x4x256xf32, #tpu.memory_space<vmem>>, %arg3: memref<2x1x256xi32, #tpu.memory_space<vmem>>, %arg4: memref<1x1x8x128xf32, #tpu.memory_space<vmem>>, %arg5: memref<1x1x8x128xf32, #tpu.memory_space<vmem>>) attributes {dimension_semantics = [#tpu.dimension_semantics<parallel>, #tpu.dimension_semantics<parallel>], iteration_bounds = array<i64: 1, 1>, scalar_prefetch = 0 : i64, scratch_operands = 0 : i64, tpu.core_type = #tpu.core_type<tc>, window_params = [{transform_indices = @transform_0, window_bounds = array<i64: 2, 4, 256>}, {transform_indices = @transform_1, window_bounds = array<i64: 2, 1, 256>}, {transform_indices = @transform_2, window_bounds = array<i64: 1, 1, 8, 128>}, {transform_indices = @transform_3, window_bounds = array<i64: 1, 1, 8, 128>}]} {
    %c0 = arith.constant 0 : index
    %c0_0 = arith.constant 0 : index
    %c0_1 = arith.constant 0 : index
    %0 = vector.load %arg2[%c0, %c0_0, %c0_1] : memref<2x4x256xf32, #tpu.memory_space<vmem>>, vector<2x4x256xf32>
    %c0_2 = arith.constant 0 : index
    %c0_3 = arith.constant 0 : index
    %c0_4 = arith.constant 0 : index
    %1 = vector.load %arg3[%c0_2, %c0_3, %c0_4] : memref<2x1x256xi32, #tpu.memory_space<vmem>>, vector<2x1x256xi32>
    %cst = arith.constant dense<0xFF800000> : vector<2x256xf32>
    %2 = vector.multi_reduction <maximumf>, %0, %cst [1] : vector<2x4x256xf32> to vector<2x256xf32>
    %3 = vector.shape_cast %2 : vector<2x256xf32> to vector<2x1x256xf32>
    %4 = vector.broadcast %3 : vector<2x1x256xf32> to vector<2x4x256xf32>
    %5 = arith.subf %0, %4 : vector<2x4x256xf32>
    %6 = math.exp %5 : vector<2x4x256xf32>
    %cst_5 = arith.constant dense<0.000000e+00> : vector<2x256xf32>
    %7 = vector.multi_reduction <add>, %6, %cst_5 [1] : vector<2x4x256xf32> to vector<2x256xf32>
    %8 = vector.shape_cast %7 : vector<2x256xf32> to vector<2x1x256xf32>
    %9 = tpu.iota {dimensions = array<i32: 1>} : vector<2x4x256xi32>
    %10 = vector.broadcast %1 : vector<2x1x256xi32> to vector<2x4x256xi32>
    %11 = arith.cmpi eq, %9, %10 : vector<2x4x256xi32>
    %cst_6 = arith.constant 0.000000e+00 : f32
    %12 = vector.broadcast %cst_6 : f32 to vector<2x4x256xf32>
    %13 = arith.select %11, %5, %12 : vector<2x4x256xi1>, vector<2x4x256xf32>
    %cst_7 = arith.constant dense<0.000000e+00> : vector<2x256xf32>
    %14 = vector.multi_reduction <add>, %13, %cst_7 [1] : vector<2x4x256xf32> to vector<2x256xf32>
    %15 = vector.shape_cast %8 : vector<2x1x256xf32> to vector<2x256xf32>
    %16 = math.log %15 : vector<2x256xf32>
    %17 = arith.subf %14, %16 : vector<2x256xf32>
    %18 = math.exp %17 : vector<2x256xf32>
    %cst_8 = arith.constant 1.000000e+00 : f32
    %19 = vector.broadcast %cst_8 : f32 to vector<2x256xf32>
    %20 = arith.subf %19, %18 : vector<2x256xf32>
    %21 = arith.mulf %20, %20 : vector<2x256xf32>
    %22 = arith.mulf %21, %17 : vector<2x256xf32>
    %23 = vector.shape_cast %1 : vector<2x1x256xi32> to vector<2x256xi32>
    %c255_i32 = arith.constant 255 : i32
    %24 = vector.broadcast %c255_i32 : i32 to vector<2x256xi32>
    %25 = arith.cmpi ne, %23, %24 : vector<2x256xi32>
    %cst_9 = arith.constant 0.000000e+00 : f32
    %26 = vector.broadcast %cst_9 : f32 to vector<2x256xf32>
    %27 = arith.subf %26, %22 : vector<2x256xf32>
    %cst_10 = arith.constant 0.000000e+00 : f32
    %28 = vector.broadcast %cst_10 : f32 to vector<2x256xf32>
    %29 = arith.select %25, %27, %28 : vector<2x256xi1>, vector<2x256xf32>
    %30 = vector.shape_cast %29 : vector<2x256xf32> to vector<1x2x256xf32>
    %cst_11 = arith.constant dense<0.000000e+00> : vector<1xf32>
    %31 = vector.multi_reduction <add>, %30, %cst_11 [1, 2] : vector<1x2x256xf32> to vector<1xf32>
    %32 = vector.shape_cast %31 : vector<1xf32> to vector<1x1x1xf32>
    %33 = vector.extract %32[0, 0, 0] : f32 from vector<1x1x1xf32>
    %34 = arith.extui %25 : vector<2x256xi1> to vector<2x256xi32>
    %35 = arith.sitofp %34 : vector<2x256xi32> to vector<2x256xf32>
    %36 = vector.shape_cast %35 : vector<2x256xf32> to vector<1x2x256xf32>
    %cst_12 = arith.constant dense<0.000000e+00> : vector<1xf32>
    %37 = vector.multi_reduction <add>, %36, %cst_12 [1, 2] : vector<1x2x256xf32> to vector<1xf32>
    %38 = vector.shape_cast %37 : vector<1xf32> to vector<1x1x1xf32>
    %39 = vector.extract %38[0, 0, 0] : f32 from vector<1x1x1xf32>
    %40 = vector.broadcast %33 : f32 to vector<1x1x8x128xf32>
    %c0_13 = arith.constant 0 : index
    %c0_14 = arith.constant 0 : index
    %c0_15 = arith.constant 0 : index
    %c0_16 = arith.constant 0 : index
    %41 = vector.load %arg4[%c0_13, %c0_14, %c0_15, %c0_16] : memref<1x1x8x128xf32, #tpu.memory_space<vmem>>, vector<1x1x8x128xf32>
    tpu.vector_store %arg4[%c0_13, %c0_14, %c0_15, %c0_16], %40 {strides = array<i32>} : memref<1x1x8x128xf32, #tpu.memory_space<vmem>>, vector<1x1x8x128xf32>,
    %42 = vector.broadcast %39 : f32 to vector<1x1x8x128xf32>
    %c0_17 = arith.constant 0 : index
    %c0_18 = arith.constant 0 : index
    %c0_19 = arith.constant 0 : index
    %c0_20 = arith.constant 0 : index
    %43 = vector.load %arg5[%c0_17, %c0_18, %c0_19, %c0_20] : memref<1x1x8x128xf32, #tpu.memory_space<vmem>>, vector<1x1x8x128xf32>
    tpu.vector_store %arg5[%c0_17, %c0_18, %c0_19, %c0_20], %42 {strides = array<i32>} : memref<1x1x8x128xf32, #tpu.memory_space<vmem>>, vector<1x1x8x128xf32>,
    return
  }
  func.func @transform_0(%arg0: i32, %arg1: i32) -> (i32, i32, i32) {
    %c0_i32 = arith.constant 0 : i32
    %c0_i32_0 = arith.constant 0 : i32
    return %arg0, %c0_i32, %arg1 : i32, i32, i32
  }
  func.func @transform_1(%arg0: i32, %arg1: i32) -> (i32, i32, i32) {
    %c0_i32 = arith.constant 0 : i32
    %c0_i32_0 = arith.constant 0 : i32
    return %arg0, %c0_i32, %arg1 : i32, i32, i32
  }
  func.func @transform_2(%arg0: i32, %arg1: i32) -> (i32, i32, i32, i32) {
    %c0_i32 = arith.constant 0 : i32
    %c0_i32_0 = arith.constant 0 : i32
    %c0_i32_1 = arith.constant 0 : i32
    return %arg0, %arg1, %c0_i32, %c0_i32_0 : i32, i32, i32, i32
  }
  func.func @transform_3(%arg0: i32, %arg1: i32) -> (i32, i32, i32, i32) {
    %c0_i32 = arith.constant 0 : i32
    %c0_i32_0 = arith.constant 0 : i32
    %c0_i32_1 = arith.constant 0 : i32
    return %arg0, %arg1, %c0_i32, %c0_i32_0 : i32, i32, i32, i32
  }
}

</mosaic_0001>

<bundles_post_ra>
// kernel: tpu_custom_call.1
= control target key start
LH: loop header
LB: loop body
LE: loop exit
PB: predicated region body
PF: predicated region fallthrough
CT: control target
= control target key end

     0   :  { %9 = vsyncpa [#allocation3], 0  ;;  %s634_s0 = inlined_call_operand.hbm [shape: f32[2,4,256], index: 0, kind: input, shape index: {}]   ;;  %s635_s1 = inlined_call_operand.hbm [shape: s32[2,1,256], index: 1, kind: input, shape index: {}]   ;;  %s636_s2 = inlined_call_operand.hbm [shape: f32[1,1,8,128], index: 2, kind: output, shape index: {0}]   ;;  %s637_s3 = inlined_call_operand.hbm [shape: f32[1,1,8,128], index: 3, kind: output, shape index: {1}]  }
   0x1   :  { %10 = vsyncpa [#allocation6], 0 }
   0x2   :  { %11 = vsyncpa [#allocation4], 0 }
   0x3   :  { %12 = vsyncpa [#allocation9], 0  ;;  %s517_s12 = smov [#allocation2]   ;;  %s421_s16 = scalar_lea.hbm %s634_s0, 256 }
   0x4   :  { %s18_s13 = sshll.u32 %s517_s12, 4  ;;  %p422_p0 = scmp.ne.s32.totalorder %s634_s0, %s421_s16  ;;  %s19_s13 = int_to_ptr.vmem [resolvable:$true] %s18_s13 }
   0x5   :  { %p425_p1 = scmp.lt.u32.totalorder %s421_s16, %s634_s0 }
   0x7   :  { %p427_p2 = pnand %p425_p1, %p422_p0 }
   0x9   :  { %430 = shalt.err (!%p427_p2)
}
   0xa   :  { %s431_s21 = scalar_lea.vmem %s19_s13, 256  ;;  %p436_p4 = scmp.lt.s32.totalorder %s19_s13, %s19_s13 }
   0xb   :  { %p432_p3 = scmp.ne.s32.totalorder %s19_s13, %s431_s21  ;;  %p437_p5 = scmp.lt.s32.totalorder %s431_s21, %s431_s21 }
   0xd   :  { %p438_p6 = por %p437_p5, %p436_p4 }
   0xf   :  { %p439_p7 = pnand %p438_p6, %p432_p3 }
  0x11   :  { %442 = shalt.err (!%p439_p7)
}
  0x12   :  { %s518_s22 = smov 128   ;;  %s519_s23 = smov 8  }
  0x13   :  { %24 = dma.hbm_to_vmem [thread:$0]  %s634_s0, 256, %s19_s13, [#allocation3], %s518_s22, %s518_s22, %s519_s23  }
  0x14   :  { %s520_s26 = smov [#allocation5]   ;;  %s443_s30 = scalar_lea.hbm %s635_s1, 64 }
  0x15   :  { %s30_s27 = sshll.u32 %s520_s26, 4  ;;  %p444_p8 = scmp.ne.s32.totalorder %s635_s1, %s443_s30  ;;  %s31_s27 = int_to_ptr.vmem [resolvable:$true] %s30_s27 }
  0x16   :  { %p447_p9 = scmp.lt.u32.totalorder %s443_s30, %s635_s1 }
  0x18   :  { %p449_p10 = pnand %p447_p9, %p444_p8 }
  0x1a   :  { %452 = shalt.err (!%p449_p10)
}
  0x1b   :  { %s453_s8 = scalar_lea.vmem %s31_s27, 64  ;;  %p458_p12 = scmp.lt.s32.totalorder %s31_s27, %s31_s27 }
  0x1c   :  { %p454_p11 = scmp.ne.s32.totalorder %s31_s27, %s453_s8  ;;  %p459_p13 = scmp.lt.s32.totalorder %s453_s8, %s453_s8 }
  0x1e   :  { %p460_p0 = por %p459_p13, %p458_p12 }
  0x20   :  { %p461_p1 = pnand %p460_p0, %p454_p11 }
  0x22   :  { %464 = shalt.err (!%p461_p1)
}
  0x23   :  { %s521_s0 = smov 32   ;;  %s522_s9 = smov 2  }
  0x24   :  { %36 = dma.hbm_to_vmem [thread:$0]  %s635_s1, 64, %s31_s27, [#allocation6], %s521_s0, %s521_s0, %s522_s9  }
  0x25   :  { %509 = dma.done.wait [#allocation3], 256  }
  0x26   :  { %510 = vsyncadd [#allocation3], 4294967040 }
  0x27   :  { %511 = dma.done.wait [#allocation6], 64  }
  0x28   :  { %512 = vsyncadd [#allocation6], 4294967232  ;;  %vm53_vm0 = vcmask 1043456   ;;  %v43_v0 = vld [vmem:[#allocation2] sm:$0xff]  ;;  %v44_v1 = vld [vmem:[#allocation2 + $0x8] sm:$0xff]  ;;  %v130_v22 = vlaneseq  ;;  %vm293_vm7 = vcmask 1041408  }
  0x29   :  { %v49_v2 = vcombine.high %v43_v0, %v43_v0  ;;  %v50_v3 = vcombine.high %v44_v1, %v44_v1  ;;  %v54_v4 = vsel %vm53_vm0, %v43_v0, -inf  ;;  %v68_v5 = vsel %vm53_vm0, %v44_v1, -inf  ;;  %v578_v39 = vld [vmem:[#allocation5] sm:$0x3]  ;;  %v581_v41 = vld [vmem:[#allocation5 + $0x2] sm:$0x3] }
  0x2a   :  { %v55_v6 = vrot.slane %v54_v4, 4  ;;  %v69_v7 = vrot.slane %v68_v5, 4  ;;  %v575_v33 = vshrl.u32 %v130_v22, 7  ;;  %vm222_vm5 = vcmp.ne.s32.totalorder %v578_v39, 255  ;;  %s525_s1 = smov [#allocation7]   ;;  %s526_s14 = smov [#allocation8]  }
  0x2b   :  { %v61_v8 = vsel %vm53_vm0, %v49_v2, -inf  ;;  %v75_v9 = vsel %vm53_vm0, %v50_v3, -inf  ;;  %vm223_vm6 = vcmp.ne.s32.totalorder %v581_v41, 255  ;;  %s359_s12 = sshll.u32 %s525_s1, 4  ;;  %s369_s15 = sshll.u32 %s526_s14, 4  ;;  %s360_s12 = int_to_ptr.vmem [resolvable:$true] %s359_s12  ;;  %s370_s15 = int_to_ptr.vmem [resolvable:$true] %s369_s15 }
  0x2c   :  { %v56_v10 = vmax.f32 %v54_v4, %v55_v6  ;;  %v62_v11 = vrot.slane %v61_v8, 4  ;;  %v70_v12 = vmax.f32 %v68_v5, %v69_v7  ;;  %v76_v13 = vrot.slane %v75_v9, 4  ;;  %s465_s16 = scalar_lea.vmem %s360_s12, 128  ;;  %p470_p3 = scmp.lt.s32.totalorder %s360_s12, %s360_s12 }
  0x2d   :  { %v134_v38 = vsub.s32 0, %v575_v33  ;;  %v138_v40 = vsub.s32 1, %v575_v33  ;;  %p466_p2 = scmp.ne.s32.totalorder %s360_s12, %s465_s16  ;;  %p471_p4 = scmp.lt.s32.totalorder %s465_s16, %s465_s16 }
  0x2e   :  { %v57_v14 = vrot.slane %v56_v10, 2  ;;  %v63_v15 = vmax.f32 %v61_v8, %v62_v11  ;;  %v71_v16 = vrot.slane %v70_v12, 2  ;;  %v77_v17 = vmax.f32 %v75_v9, %v76_v13 }
  0x2f   :  { %v135_v44 = vrot.slane %v578_v39, %v134_v38  ;;  %v143_v45 = vrot.slane %v581_v41, %v134_v38  ;;  %v139_v46 = vrot.slane %v578_v39, %v138_v40  ;;  %v147_v47 = vrot.slane %v581_v41, %v138_v40  ;;  %p472_p5 = por %p471_p4, %p470_p3 }
  0x30   :  { %v58_v18 = vmax.f32 %v56_v10, %v57_v14  ;;  %v64_v19 = vrot.slane %v63_v15, 2  ;;  %v72_v20 = vmax.f32 %v70_v12, %v71_v16  ;;  %v78_v21 = vrot.slane %v77_v17, 2 }
  0x31   :  { %vm148_vm1 = vcmp.eq.s32.totalorder %v575_v33, %v135_v44  ;;  %vm150_vm2 = vcmp.eq.s32.totalorder %v575_v33, %v143_v45  ;;  %vm149_vm3 = vcmp.eq.s32.totalorder %v575_v33, %v139_v46  ;;  %vm151_vm4 = vcmp.eq.s32.totalorder %v575_v33, %v147_v47  ;;  %p473_p6 = pnand %p472_p5, %p466_p2 }
  0x32   :  { %v59_v23 = vrot.slane %v58_v18, 1  ;;  %v65_v24 = vmax.f32 %v63_v15, %v64_v19  ;;  %v73_v25 = vrot.slane %v72_v20, 1  ;;  %v79_v26 = vmax.f32 %v77_v17, %v78_v21 }
  0x34   :  { %v60_v27 = vmax.f32 %v58_v18, %v59_v23  ;;  %v66_v28 = vrot.slane %v65_v24, 1  ;;  %v74_v29 = vmax.f32 %v72_v20, %v73_v25  ;;  %v80_v30 = vrot.slane %v79_v26, 1 }
  0x36   :  { %v67_v31 = vmax.f32 %v65_v24, %v66_v28  ;;  %v81_v32 = vmax.f32 %v79_v26, %v80_v30 }
  0x38   :  { %v86_v34 = vcombine.low %v60_v27, %v67_v31  ;;  %v87_v35 = vcombine.low %v74_v29, %v81_v32 }
  0x3a   :  { %v90_v36 = vsub.f32 %v43_v0, %v86_v34  ;;  %v91_v37 = vsub.f32 %v44_v1, %v87_v35 }
  0x3c   :  { %v92_v42 = vmul.f32 1.442695, %v90_v36  ;;  %v94_v43 = vmul.f32 1.442695, %v91_v37  ;;  %v154_v48 = vcombine.high %v90_v36, %v90_v36  ;;  %v155_v49 = vcombine.high %v91_v37, %v91_v37 }
  0x3d   :  { %v158_v50 = vsel %vm148_vm1, %v90_v36, 0.0  ;;  %v160_v51 = vsel %vm150_vm2, %v91_v37, 0.0 }
  0x3e   :  { %401 = vpow2.f32 %v92_v42  ;;  %v159_v52 = vsel %vm149_vm3, %v154_v48, 0.0  ;;  %v161_v54 = vsel %vm151_vm4, %v155_v49, 0.0  ;;  %v162_v55 = vsel %vm53_vm0, %v158_v50, 0.0 }
  0x3f   :  { %403 = vpow2.f32 %v94_v43  ;;  %v176_v59 = vsel %vm53_vm0, %v160_v51, 0.0  ;;  %v169_v63 = vsel %vm53_vm0, %v159_v52, 0.0  ;;  %v163_v2 = vrot.slane %v162_v55, 4 }
  0x40   :  { %v183_v3 = vsel %vm53_vm0, %v161_v54, 0.0  ;;  %v177_v7 = vrot.slane %v176_v59, 4  ;;  %v170_v10 = vrot.slane %v169_v63, 4 }
  0x41   :  { %v184_v13 = vrot.slane %v183_v3, 4  ;;  %v164_v16 = vadd.f32 %v163_v2, %v162_v55 }
  0x42   :  { %v178_v19 = vadd.f32 %v177_v7, %v176_v59  ;;  %v171_v22 = vadd.f32 %v170_v10, %v169_v63 }
  0x43   :  { %v185_v25 = vadd.f32 %v184_v13, %v183_v3  ;;  %v165_v28 = vrot.slane %v164_v16, 2 }
  0x44   :  { %v179_v31 = vrot.slane %v178_v19, 2  ;;  %v172_v35 = vrot.slane %v171_v22, 2 }
  0x45   :  { %v186_v37 = vrot.slane %v185_v25, 2  ;;  %v166_v40 = vadd.f32 %v165_v28, %v164_v16 }
  0x46   :  { %v180_v42 = vadd.f32 %v179_v31, %v178_v19  ;;  %v173_v43 = vadd.f32 %v172_v35, %v171_v22 }
  0x47   :  { %v187_v44 = vadd.f32 %v186_v37, %v185_v25  ;;  %v167_v45 = vrot.slane %v166_v40, 1 }
  0x48   :  { %v402_v53 = vpop.eup %401  ;;  %v181_v46 = vrot.slane %v180_v42, 1  ;;  %v174_v47 = vrot.slane %v173_v43, 1 }
  0x49   :  { %v404_v56 = vpop.eup %403  ;;  %v98_v57 = vcombine.high %v402_v53, %v402_v53  ;;  %v102_v58 = vsel %vm53_vm0, %v402_v53, 0.0  ;;  %v188_v48 = vrot.slane %v187_v44, 1  ;;  %v168_v49 = vadd.f32 %v167_v45, %v166_v40 }
  0x4a   :  { %v99_v60 = vcombine.high %v404_v56, %v404_v56  ;;  %v103_v61 = vrot.slane %v102_v58, 4  ;;  %v116_v62 = vsel %vm53_vm0, %v404_v56, 0.0  ;;  %v182_v51 = vadd.f32 %v181_v46, %v180_v42 }
  0x4b   :  { %v109_v0 = vsel %vm53_vm0, %v98_v57, 0.0  ;;  %v117_v1 = vrot.slane %v116_v62, 4  ;;  %v175_v53 = vadd.f32 %v174_v47, %v173_v43  ;;  %v189_v56 = vadd.f32 %v188_v48, %v187_v44 }
  0x4c   :  { %v104_v4 = vadd.f32 %v103_v61, %v102_v58  ;;  %v110_v5 = vrot.slane %v109_v0, 4  ;;  %v123_v6 = vsel %vm53_vm0, %v99_v60, 0.0 }
  0x4d   :  { %v118_v8 = vadd.f32 %v117_v1, %v116_v62  ;;  %v124_v9 = vrot.slane %v123_v6, 4 }
  0x4e   :  { %v105_v11 = vrot.slane %v104_v4, 2  ;;  %v111_v12 = vadd.f32 %v110_v5, %v109_v0 }
  0x4f   :  { %v119_v14 = vrot.slane %v118_v8, 2  ;;  %v125_v15 = vadd.f32 %v124_v9, %v123_v6 }
  0x50   :  { %v106_v17 = vadd.f32 %v105_v11, %v104_v4  ;;  %v112_v18 = vrot.slane %v111_v12, 2 }
  0x51   :  { %v120_v20 = vadd.f32 %v119_v14, %v118_v8  ;;  %v126_v21 = vrot.slane %v125_v15, 2  ;;  %v523_v8 = vmov 1966171168  }
  0x52   :  { %v107_v23 = vrot.slane %v106_v17, 1  ;;  %v113_v24 = vadd.f32 %v112_v18, %v111_v12  ;;  %v234_v9 = vunpack.c.l.s4 %v523_v8 }
  0x53   :  { %v121_v26 = vrot.slane %v120_v20, 1  ;;  %v127_v27 = vadd.f32 %v126_v21, %v125_v15 }
  0x54   :  { %v108_v29 = vadd.f32 %v107_v23, %v106_v17  ;;  %v114_v30 = vrot.slane %v113_v24, 1  ;;  %v235_v19 = vunpack.c.0.s8 %v234_v9 }
  0x55   :  { %v122_v32 = vadd.f32 %v121_v26, %v120_v20  ;;  %v128_v34 = vrot.slane %v127_v27, 1  ;;  %v524_v26 = vmov 0.0  }
  0x56   :  { %v115_v36 = vadd.f32 %v114_v30, %v113_v24  ;;  %405 = vlog2.f32 %v108_v29  ;;  %v384_v28 = vsel %vm223_vm6, 1.0, %v524_v26  ;;  %v238_v30 = vsub.s32 %v235_v19, %v575_v33 }
  0x57   :  { %v129_v38 = vadd.f32 %v128_v34, %v127_v27  ;;  %407 = vlog2.f32 %v122_v32  ;;  %v383_v27 = vsel %vm222_vm5, 1.0, %v524_v26 }
  0x58   :  { %409 = vlog2.f32 %v115_v36  ;;  %v312_v34 = vcombine.low %v383_v27, %v384_v28 }
  0x59   :  { %411 = vlog2.f32 %v129_v38 }
  0x5a   :  { %v319_v40 = vrot.slane %v312_v34, %v238_v30 }
  0x5c   :  { %v320_v46 = vcombine.high %v319_v40, %v319_v40 }
  0x60   :  { %v406_v50 = vpop.eup %405 }
  0x61   :  { %v408_v52 = vpop.eup %407  ;;  %v191_v54 = vmul.f32 0.6931472, %v406_v50  ;;  %v334_v50 = vrot.slane %v320_v46, %v238_v30 }
  0x62   :  { %v410_v55 = vpop.eup %409  ;;  %v195_v57 = vmul.f32 0.6931472, %v408_v52 }
  0x63   :  { %v412_v58 = vpop.eup %411  ;;  %v193_v59 = vmul.f32 0.6931472, %v410_v55  ;;  %v198_v60 = vsub.f32 %v168_v49, %v191_v54  ;;  %v327_v49 = vrot.slane %v319_v40, %v238_v30  ;;  %v338_v55 = vsel %vm293_vm7, %v334_v50, 0.0 }
  0x64   :  { %v197_v61 = vmul.f32 0.6931472, %v412_v58  ;;  %v200_v62 = vsub.f32 %v182_v51, %v195_v57 }
  0x65   :  { %v199_v63 = vsub.f32 %v175_v53, %v193_v59  ;;  %v202_v0 = vmul.f32 1.442695, %v198_v60  ;;  %v337_v54 = vsel %vm293_vm7, %v327_v49, 0.0 }
  0x66   :  { %v201_v1 = vsub.f32 %v189_v56, %v197_v61  ;;  %v206_v2 = vmul.f32 1.442695, %v200_v62  ;;  %v339_v39 = vadd.f32 %v338_v55, %v337_v54 }
  0x67   :  { %413 = vpow2.f32 %v202_v0  ;;  %v204_v3 = vmul.f32 1.442695, %v199_v63 }
  0x68   :  { %415 = vpow2.f32 %v206_v2  ;;  %v208_v4 = vmul.f32 1.442695, %v201_v1 }
  0x69   :  { %417 = vpow2.f32 %v204_v3 }
  0x6a   :  { %419 = vpow2.f32 %v208_v4 }
  0x71   :  { %v414_v5 = vpop.eup %413 }
  0x72   :  { %v416_v6 = vpop.eup %415  ;;  %v210_v7 = vsub.f32 1.0, %v414_v5 }
  0x73   :  { %v418_v10 = vpop.eup %417  ;;  %v212_v11 = vsub.f32 1.0, %v416_v6 }
  0x74   :  { %v420_v12 = vpop.eup %419  ;;  %v211_v13 = vsub.f32 1.0, %v418_v10  ;;  %v214_v14 = vmul.f32 %v210_v7, %v210_v7 }
  0x75   :  { %v213_v15 = vsub.f32 1.0, %v420_v12  ;;  %v216_v16 = vmul.f32 %v212_v11, %v212_v11 }
  0x76   :  { %v215_v17 = vmul.f32 %v211_v13, %v211_v13  ;;  %v218_v18 = vmul.f32 %v214_v14, %v198_v60 }
  0x77   :  { %v217_v20 = vmul.f32 %v213_v15, %v213_v15  ;;  %v220_v21 = vmul.f32 %v216_v16, %v200_v62 }
  0x78   :  { %v219_v22 = vmul.f32 %v215_v17, %v199_v63  ;;  %v224_v23 = vsub.f32 0.0, %v218_v18 }
  0x79   :  { %v221_v24 = vmul.f32 %v217_v20, %v201_v1  ;;  %v226_v25 = vsub.f32 0.0, %v220_v21 }
  0x7a   :  { %v225_v29 = vsub.f32 0.0, %v219_v22 }
  0x7b   :  { %v227_v31 = vsub.f32 0.0, %v221_v24 }
  0x7c   :  { %v232_v32 = vcombine.low %v224_v23, %v225_v29 }
  0x7d   :  { %v247_v35 = vcombine.low %v226_v25, %v227_v31 }
  0x7e   :  { %v239_v36 = vrot.slane %v232_v32, %v238_v30 }
  0x7f   :  { %v254_v37 = vrot.slane %v247_v35, %v238_v30 }
  0x80   :  { %v246_v38 = vrot.slane %v239_v36, %v238_v30 }
  0x81   :  { %v261_v42 = vrot.slane %v254_v37, %v238_v30 }
  0x82   :  { %v264_v43 = vsel %vm222_vm5, %v246_v38, 0.0 }
  0x83   :  { %v265_v44 = vsel %vm223_vm6, %v261_v42, 0.0 }
  0x84   :  { %v268_v45 = vcombine.low %v264_v43, %v265_v44 }
  0x86   :  { %v275_v47 = vrot.slane %v268_v45, %v238_v30 }
  0x88   :  { %v276_v33 = vcombine.high %v275_v47, %v275_v47  ;;  %v283_v48 = vrot.slane %v275_v47, %v238_v30 }
  0x8a   :  { %v290_v51 = vrot.slane %v276_v33, %v238_v30  ;;  %v294_v52 = vsel %vm293_vm7, %v283_v48, 0.0 }
  0x8c   :  { %v295_v53 = vsel %vm293_vm7, %v290_v51, 0.0 }
  0x8d   :  { %v296_v56 = vadd.f32 %v295_v53, %v294_v52 }
  0x8f   :  { %297 = vadd.xlane.f32.xlu0 %v296_v56 }
  0x93   :  { %340 = vadd.xlane.f32.xlu0 %v339_v39 }
 0x11c   :  { %v298_v57 = vpop.xlane.xlu0 %297 }
 0x11d   :  { %v299_v41 = vrot.slane %v298_v57, 4 }
 0x11f   :  { %v300_v58 = vadd.f32 %v299_v41, %v298_v57 }
 0x120   :  { %v341_v59 = vpop.xlane.xlu0 %340 }
 0x121   :  { %v301_v60 = vrot.slane %v300_v58, 2  ;;  %v342_v61 = vrot.slane %v341_v59, 4 }
 0x123   :  { %v343_v62 = vadd.f32 %v342_v61, %v341_v59  ;;  %v302_v63 = vadd.f32 %v301_v60, %v300_v58 }
 0x125   :  { %v344_v0 = vrot.slane %v343_v62, 2  ;;  %v303_v1 = vrot.slane %v302_v63, 1 }
 0x127   :  { %v345_v2 = vadd.f32 %v344_v0, %v343_v62  ;;  %v304_v3 = vadd.f32 %v303_v1, %v302_v63 }
 0x129   :  { %385 = vpush %v304_v3  ;;  %v346_v4 = vrot.slane %v345_v2, 1 }
 0x12b   :  { %v347_v5 = vadd.f32 %v346_v4, %v345_v2 }
 0x12d   :  { %387 = vpush %v347_v5 }
 0x15a   :  { %s386_s13 = spop %385 }
 0x15b   :  { %v349_v6 = vstv %s386_s13 }
 0x15c   :  { %350 = vst [vmem:[#allocation7] sm:$0xff] %v349_v6 }
 0x15d   :  { %476 = shalt.err (!%p473_p6)
}
 0x15e   :  { %s477_s19 = scalar_lea.hbm %s636_s2, 128 }
 0x15f   :  { %p478_p7 = scmp.ne.s32.totalorder %s636_s2, %s477_s19  ;;  %p481_p8 = scmp.lt.u32.totalorder %s477_s19, %s636_s2 }
 0x161   :  { %p483_p9 = pnand %p481_p8, %p478_p7 }
 0x163   :  { %486 = shalt.err (!%p483_p9)
}
 0x164   :  { %362 = dma.vmem_to_hbm [thread:$0]  %s360_s12, 128, %s636_s2, [#allocation4]  }
 0x165   :  { %s388_s26 = spop %387  ;;  %s487_s27 = scalar_lea.vmem %s370_s15, 128 }
 0x166   :  { %v351_v7 = vstv %s388_s26  ;;  %p488_p10 = scmp.ne.s32.totalorder %s370_s15, %s487_s27  ;;  %p492_p11 = scmp.lt.s32.totalorder %s370_s15, %s370_s15 }
 0x167   :  { %352 = vst [vmem:[#allocation8] sm:$0xff] %v351_v7  ;;  %p493_p12 = scmp.lt.s32.totalorder %s487_s27, %s487_s27 }
 0x169   :  { %p494_p13 = por %p493_p12, %p492_p11 }
 0x16b   :  { %p495_p0 = pnand %p494_p13, %p488_p10 }
 0x16d   :  { %498 = shalt.err (!%p495_p0)
}
 0x16e   :  { %s499_s30 = scalar_lea.hbm %s637_s3, 128 }
 0x16f   :  { %p500_p1 = scmp.ne.s32.totalorder %s637_s3, %s499_s30  ;;  %p503_p2 = scmp.lt.u32.totalorder %s499_s30, %s637_s3 }
 0x171   :  { %p505_p3 = pnand %p503_p2, %p500_p1 }
 0x173   :  { %508 = shalt.err (!%p505_p3)
}
 0x174   :  { %372 = dma.vmem_to_hbm [thread:$0]  %s370_s15, 128, %s637_s3, [#allocation9]  }
 0x175   :  { %513 = dma.done.wait [#allocation4], 128  }
 0x176   :  { %514 = vsyncadd [#allocation4], 4294967168 }
 0x177   :  { %515 = dma.done.wait [#allocation9], 128  }
 0x178   :  { %516 = vsyncadd [#allocation9], 4294967168 }
 0x179   :  { %379 = vsyncpa [#allocation3], 1 }
 0x17a   :  { %380 = vsyncpa [#allocation6], 1 }
 0x17b   :  { %381 = vsyncpa [#allocation4], 1 }
 0x17c   :  { %382 = vsyncpa [#allocation9], 1 }

</bundles_post_ra>
